<compile_context>
chip_gen: v5e
topology: v5e:2x2
jax: 0.10.0
libtpu: 0.0.40
codegen_flags: <defaults>
</compile_context>

<pallas_src>
import functools
import math

import jax
import jax.numpy as jnp
from jax.experimental import pallas as pl
from jax.experimental.pallas import tpu as pltpu

LANE = 128                    # vreg lane width
TM_MAX = 32768                # max lane extent of a block (multiple of 128)
BN_MAX = 1024                 # max sublane extent (bounds the (BN,1) scale buffer)
TARGET_BLOCK_BYTES = 4 << 20  # ~4 MiB data tile: amortizes ~0.35us/step even
                              # against v7x's ~3.2 TB/s HBM


def _lsq_kernel(x_ref, inv_s_ref, s_ref, o_ref, *, thd_neg, thd_pos):
    """Elementwise LSQ quantization for one (BN, TM) tile.

    x_ref:     (BN, TM) input tile (any float dtype)
    inv_s_ref: (BN, 1)  per-row reciprocal scale, float32 (precomputed)
    s_ref:     (BN, 1)  per-row scale, float32
    o_ref:     (BN, TM) output tile (same dtype as input)
    """
    inv_s = inv_s_ref[...]                 # (BN, 1) f32
    s = s_ref[...]                         # (BN, 1) f32
    x = x_ref[...].astype(jnp.float32)     # compute in f32 (v5e has no bf16 VPU)
    xs = jnp.clip(x * inv_s, thd_neg, thd_pos)
    # torch.round and jnp.round both round half-to-even.
    o_ref[...] = (jnp.round(xs) * s).astype(o_ref.dtype)


def _largest_aligned_divisor(m, cap):
    """Largest multiple-of-LANE divisor of m that is <= cap (m % LANE == 0)."""
    q = m // LANE
    cap_q = max(1, cap // LANE)
    best = 1
    for d in range(1, q + 1):
        if d > cap_q:
            break
        if q % d == 0:
            best = d
    return best * LANE


def _choose_blocks(n, m, itemsize):
    """Pick (BN, TM) block shape for a (n, m) array of `itemsize`-byte elems."""
    # Lane (last) dim: full extent if it fits, else a big multiple of 128
    # (partial tail block is masked by Pallas).
    tm = m if m <= TM_MAX else TM_MAX
    # Sublane dim: enough rows to hit the target block size; must be a
    # multiple of 8 or equal to the full extent.
    if n <= 8:
        bn = n
    else:
        rows = max(8, TARGET_BLOCK_BYTES // max(1, tm * itemsize))
        rows = (int(rows) // 8) * 8
        bn = max(8, min(rows, BN_MAX, (n // 8) * 8))
    # v7x has 2 TensorCores: make sure medium/large tensors give >= 2 grid
    # steps so the single-block case cannot idle a core.
    if (pl.cdiv(n, bn) * pl.cdiv(m, tm) < 2) and (n * m * itemsize > (1 << 20)):
        if m >= 2 * LANE:
            tm = max(LANE, ((m // 2) // LANE) * LANE)
        elif bn >= 16:
            bn = max(8, ((bn // 2) // 8) * 8)
    return bn, tm


def lsq_quan_forward(x, s, bit=4, all_positive=False, symmetric=False):
    """Forward pass of LsqQuan (per_channel=True).

    x: array of shape (N, ...) — any trailing dims.
    s: per-channel scale of shape (N, 1, 1, ...) (or broadcastable to it).
    """
    if all_positive:
        assert not symmetric
        thd_neg, thd_pos = 0, 2 ** bit - 1
    elif symmetric:
        thd_neg, thd_pos = -(2 ** (bit - 1)) + 1, 2 ** (bit - 1) - 1
    else:
        thd_neg, thd_pos = -(2 ** (bit - 1)), 2 ** (bit - 1) - 1

    orig_shape = x.shape
    n = x.shape[0]
    m = int(math.prod(x.shape[1:]))
    itemsize = jnp.dtype(x.dtype).itemsize

    # Free-view 2-D layout: (channels, per-channel elements) + (N,1) scales.
    x2 = x.reshape(n, m)
    s_chan = jnp.reshape(s, (n, 1)).astype(jnp.float32)
    inv_s = 1.0 / s_chan                       # hoisted out of the kernel

    # Tiny-channel fallback: re-view as sublane-dense rows when N < 8 and the
    # per-channel size is 128-aligned (keeps vreg sublane packing dense).
    n2, m2 = n, m
    if n < 8 and m % LANE == 0 and n * m >= 8 * LANE:
        w = _largest_aligned_divisor(m, min(TM_MAX, (n * m) // 8))
        r = m // w
        if r > 1:
            x2 = x2.reshape(n * r, w)
            s_chan = jnp.repeat(s_chan, r, axis=0)   # tiny: n < 8
            inv_s = jnp.repeat(inv_s, r, axis=0)
            n2, m2 = n * r, w

    bn, tm = _choose_blocks(n2, m2, itemsize)
    grid = (pl.cdiv(n2, bn), pl.cdiv(m2, tm))

    kernel = functools.partial(
        _lsq_kernel, thd_neg=float(thd_neg), thd_pos=float(thd_pos)
    )

    # VMEM budget: double-buffered input + output tiles + small scale slivers,
    # with headroom; capped at 32 MiB (safe on v7x's 64 MiB physical VMEM).
    block_bytes = bn * tm * itemsize
    vmem_limit = int(min(max(6 * block_bytes + (1 << 20), 16 << 20), 32 << 20))

    out2 = pl.pallas_call(
        kernel,
        out_shape=jax.ShapeDtypeStruct((n2, m2), x.dtype),
        grid_spec=pltpu.PrefetchScalarGridSpec(
            num_scalar_prefetch=0,
            grid=grid,
            in_specs=[
                pl.BlockSpec((bn, tm), lambda i, j: (i, j)),
                pl.BlockSpec((bn, 1), lambda i, j: (i, 0)),
                pl.BlockSpec((bn, 1), lambda i, j: (i, 0)),
            ],
            out_specs=pl.BlockSpec((bn, tm), lambda i, j: (i, j)),
        ),
        compiler_params=pltpu.CompilerParams(
            dimension_semantics=("parallel", "parallel"),
            vmem_limit_bytes=vmem_limit,
        ),
        cost_estimate=pl.CostEstimate(
            flops=6 * n2 * m2,
            transcendentals=0,
            bytes_accessed=2 * n2 * m2 * itemsize + 2 * n2 * 4,
        ),
    )(x2, inv_s, s_chan)

    return out2.reshape(orig_shape)


def lsq_init_s(x, bit=4):
    """Deterministic parameter init, mirroring LsqQuan.init_from (per_channel).

    s = mean(|x|, dims 1..) * 2 / sqrt(thd_pos), keepdim -> shape (N,1,1,...).
    (Plain-JAX glue: parameter setup, not the forward hot path.)
    """
    thd_pos = 2 ** (bit - 1) - 1
    axes = tuple(range(1, x.ndim))
    return jnp.mean(jnp.abs(x), axis=axes, keepdims=True) * 2.0 / (thd_pos ** 0.5)


def lsq_reference(x, s, bit=4):
    """Pure-JAX reference of the PyTorch forward (exact x / s)."""
    thd_neg = -(2 ** (bit - 1))
    thd_pos = 2 ** (bit - 1) - 1
    xs = jnp.clip(x / s, thd_neg, thd_pos)
    return jnp.round(xs) * s


def _check(y, y_ref, s):
    """Match the divide-based reference; tolerate a single-level shift at
    exact round/clamp float ties (x*(1/s) vs x/s can differ by <=1 ulp)."""
    step = jnp.broadcast_to(s.astype(jnp.float32), y.shape)
    err = jnp.abs(y.astype(jnp.float32) - y_ref.astype(jnp.float32))
    ok = (err <= 1e-6) | (jnp.abs(err - step) <= 1e-5)
    assert bool(jnp.all(ok)), "mismatch vs reference"


if __name__ == "__main__":
    bit = 4
    key = jax.random.PRNGKey(0)
    k1, k2, k3 = jax.random.split(key, 3)

    # Case 1: small NCHW conv-activation-like tensor, N < 8, M % 128 == 0
    # (exercises the sublane-dense row fallback).
    x1 = jax.random.normal(k1, (2, 4, 16, 16), dtype=jnp.float32)
    s1 = lsq_init_s(x1, bit=bit)                  # shape (2, 1, 1, 1)
    y1 = jax.block_until_ready(lsq_quan_forward(x1, s1, bit=bit))
    assert y1.shape == x1.shape and y1.dtype == x1.dtype
    _check(y1, lsq_reference(x1, s1, bit=bit), s1)

    # Case 2: trailing size NOT a multiple of 128 with N < 8 (exercises the
    # full-extent unaligned block path, no pad/slice).
    x2 = jax.random.normal(k2, (4, 3, 7, 9), dtype=jnp.float32)
    s2 = lsq_init_s(x2, bit=bit)                  # shape (4, 1, 1, 1)
    y2 = jax.block_until_ready(lsq_quan_forward(x2, s2, bit=bit))
    assert y2.shape == x2.shape and y2.dtype == x2.dtype
    _check(y2, lsq_reference(x2, s2, bit=bit), s2)

    # Case 3: N >= 8 with unaligned per-channel size (main 2-D grid path).
    x3 = jax.random.normal(k3, (16, 8, 10, 10), dtype=jnp.float32)
    s3 = lsq_init_s(x3, bit=bit)                  # shape (16, 1, 1, 1)
    y3 = jax.block_until_ready(lsq_quan_forward(x3, s3, bit=bit))
    assert y3.shape == x3.shape and y3.dtype == x3.dtype
    _check(y3, lsq_reference(x3, s3, bit=bit), s3)

    print("KERNEL_OK")
</pallas_src>

<mosaic_0001>
module attributes {stable_mosaic.version = 11 : i64} {
  func.func @_lsq_kernel(%arg0: i32, %arg1: i32, %arg2: memref<8x256xf32, #tpu.memory_space<vmem>>, %arg3: memref<8x1xf32, #tpu.memory_space<vmem>>, %arg4: memref<8x1xf32, #tpu.memory_space<vmem>>, %arg5: memref<8x256xf32, #tpu.memory_space<vmem>>) attributes {dimension_semantics = [#tpu.dimension_semantics<parallel>, #tpu.dimension_semantics<parallel>], iteration_bounds = array<i64: 1, 1>, scalar_prefetch = 0 : i64, scratch_operands = 0 : i64, tpu.core_type = #tpu.core_type<tc>, window_params = [{transform_indices = @transform_0, window_bounds = array<i64: 8, 256>}, {transform_indices = @transform_1, window_bounds = array<i64: 8, 1>}, {transform_indices = @transform_2, window_bounds = array<i64: 8, 1>}, {transform_indices = @transform_3, window_bounds = array<i64: 8, 256>}]} {
    %c0 = arith.constant 0 : index
    %c0_0 = arith.constant 0 : index
    %0 = vector.load %arg3[%c0, %c0_0] : memref<8x1xf32, #tpu.memory_space<vmem>>, vector<8x1xf32>
    %c0_1 = arith.constant 0 : index
    %c0_2 = arith.constant 0 : index
    %1 = vector.load %arg4[%c0_1, %c0_2] : memref<8x1xf32, #tpu.memory_space<vmem>>, vector<8x1xf32>
    %c0_3 = arith.constant 0 : index
    %c0_4 = arith.constant 0 : index
    %2 = vector.load %arg2[%c0_3, %c0_4] : memref<8x256xf32, #tpu.memory_space<vmem>>, vector<8x256xf32>
    %3 = vector.broadcast %0 : vector<8x1xf32> to vector<8x256xf32>
    %4 = arith.mulf %2, %3 : vector<8x256xf32>
    %cst = arith.constant -8.000000e+00 : f32
    %cst_5 = arith.constant 7.000000e+00 : f32
    %5 = vector.broadcast %cst : f32 to vector<8x256xf32>
    %6 = arith.maximumf %5, %4 : vector<8x256xf32>
    %7 = vector.broadcast %cst_5 : f32 to vector<8x256xf32>
    %8 = arith.minimumf %7, %6 : vector<8x256xf32>
    %9 = math.roundeven %8 : vector<8x256xf32>
    %10 = vector.broadcast %1 : vector<8x1xf32> to vector<8x256xf32>
    %11 = arith.mulf %9, %10 : vector<8x256xf32>
    %c0_6 = arith.constant 0 : index
    %c0_7 = arith.constant 0 : index
    %12 = vector.load %arg5[%c0_6, %c0_7] : memref<8x256xf32, #tpu.memory_space<vmem>>, vector<8x256xf32>
    tpu.vector_store %arg5[%c0_6, %c0_7], %11 {strides = array<i32>} : memref<8x256xf32, #tpu.memory_space<vmem>>, vector<8x256xf32>,
    return
  }
  func.func @transform_0(%arg0: i32, %arg1: i32) -> (i32, i32) {
    %c0_i32 = arith.constant 0 : i32
    return %arg0, %arg1 : i32, i32
  }
  func.func @transform_1(%arg0: i32, %arg1: i32) -> (i32, i32) {
    %c0_i32 = arith.constant 0 : i32
    %c0_i32_0 = arith.constant 0 : i32
    return %arg0, %c0_i32 : i32, i32
  }
  func.func @transform_2(%arg0: i32, %arg1: i32) -> (i32, i32) {
    %c0_i32 = arith.constant 0 : i32
    %c0_i32_0 = arith.constant 0 : i32
    return %arg0, %c0_i32 : i32, i32
  }
  func.func @transform_3(%arg0: i32, %arg1: i32) -> (i32, i32) {
    %c0_i32 = arith.constant 0 : i32
    return %arg0, %arg1 : i32, i32
  }
}

</mosaic_0001>

<bundles_post_ra>
// kernel: tpu_custom_call.1
= control target key start
LH: loop header
LB: loop body
LE: loop exit
PB: predicated region body
PF: predicated region fallthrough
CT: control target
= control target key end

     0   :  { %v102_v1 = vmov 0   ;;  %s139_s0 = inlined_call_operand.vmem [shape: f32[8,256], index: 0, kind: input, shape index: {}]   ;;  %s140_s1 = inlined_call_operand.vmem [shape: f32[8,1], index: 1, kind: input, shape index: {}]   ;;  %s141_s2 = inlined_call_operand.vmem [shape: f32[8,1], index: 2, kind: input, shape index: {}]   ;;  %s142_s3 = inlined_call_operand.hbm [shape: f32[8,256], index: 3, kind: output, shape index: {}]  }
   0x1   :  { %v15_v0 = vld [vmem:[%s140_s1] sm:$0xff]  ;;  %75 = vset.pattern.permute.xlu0 %v102_v1 }
   0x2   :  { %8 = vsyncpa [#allocation3], 0  ;;  %21 = vperm.xlu0 %75, %v15_v0   ;;  %v16_v2 = vld [vmem:[%s141_s2] sm:$0xff]  ;;  %v18_v4 = vld [vmem:[%s139_s0 + $0x8] sm:$0xff]  ;;  %s48_s21 = sshll.u32 %s142_s3, 4  ;;  %s49_s21 = int_to_ptr.hbm [resolvable:$true] %s48_s21 }
   0x3   :  { %v17_v3 = vld [vmem:[%s139_s0] sm:$0xff]  ;;  %s103_s0 = smov [#allocation2]  }
   0x4   :  { %s46_s1 = sshll.u32 %s103_s0, 4  ;;  %s47_s1 = int_to_ptr.vmem [resolvable:$true] %s46_s1 }
   0xa   :  { %34 = vperm.xlu0 %75, %v16_v2  }
  0x74   :  { %v22_v5 = vpop.permute.xlu0 %21 }
  0x75   :  { %v24_v6 = vmul.f32 %v22_v5, %v17_v3  ;;  %v25_v7 = vmul.f32 %v22_v5, %v18_v4 }
  0x77   :  { %v26_v8 = vmax.f32 %v24_v6, -8.0  ;;  %v27_v9 = vmax.f32 %v25_v7, -8.0 }
  0x79   :  { %v28_v10 = vmin.f32 %v26_v8, 7.0  ;;  %v29_v11 = vmin.f32 %v27_v9, 7.0 }
  0x7b   :  { %v59_v12 = vcvt.f32.s32 %v28_v10  ;;  %v67_v13 = vcvt.f32.s32 %v29_v11  ;;  %v57_v15 = vand.u32 2147483647, %v28_v10  ;;  %v62_v18 = vand.u32 2147483648, %v28_v10 }
  0x7c   :  { %v65_v19 = vand.u32 2147483647, %v29_v11  ;;  %v70_v21 = vand.u32 2147483648, %v29_v11  ;;  %v35_v25 = vpop.permute.xlu0 %34 }
  0x7d   :  { %v60_v14 = vcvt.s32.f32 %v59_v12  ;;  %v68_v16 = vcvt.s32.f32 %v67_v13  ;;  %vm58_vm0 = vcmp.lt.f32.partialorder %v57_v15, 8388608.0 }
  0x7e   :  { %vm66_vm1 = vcmp.lt.f32.partialorder %v65_v19, 8388608.0 }
  0x7f   :  { %v61_v17 = vand.u32 2147483647, %v60_v14  ;;  %v69_v20 = vand.u32 2147483647, %v68_v16 }
  0x81   :  { %v63_v22 = vor.u32 %v62_v18, %v61_v17  ;;  %v71_v23 = vor.u32 %v70_v21, %v69_v20 }
  0x83   :  { %v64_v24 = vsel %vm58_vm0, %v63_v22, %v28_v10  ;;  %v72_v26 = vsel %vm66_vm1, %v71_v23, %v29_v11 }
  0x84   :  { %v37_v27 = vmul.f32 %v64_v24, %v35_v25  ;;  %v38_v28 = vmul.f32 %v72_v26, %v35_v25 }
  0x86   :  { %39 = vst [vmem:[#allocation2] sm:$0xff] %v37_v27 }
  0x87   :  { %40 = vst [vmem:[#allocation2 + $0x8] sm:$0xff] %v38_v28 }
  0x88   :  { %51 = dma.vmem_to_hbm [thread:$0]  %s47_s1, 256, %s49_s21, [#allocation3]  }
  0x89   :  { %100 = dma.done.wait [#allocation3], 256  }
  0x8a   :  { %101 = vsyncadd [#allocation3], 4294967040 }
  0x8b   :  { %56 = vsyncpa [#allocation3], 1 }

</bundles_post_ra>
